<compile_context>
chip_gen: v7x
topology: tpu7x:2x2x1
jax: 0.10.0
libtpu: 0.0.40
codegen_flags: <defaults>
</compile_context>

<pallas_src>
import functools
import math

import jax
import jax.numpy as jnp
from jax import lax
from jax.experimental import pallas as pl
from jax.experimental.pallas import tpu as pltpu


# ----------------------------- tiling helpers ------------------------------

# Targets sized against v7x's 64 MiB VMEM (also fine on v5e/v6e); at the tiny demo
# shapes below they degenerate to full-array blocks, which is always legal.
TM_LIN, TN_LIN, TK_LIN = 256, 512, 512
TM_LN = 256
VMEM_LIMIT = 64 * 1024 * 1024


def _tile(dim, target, align):
    """Largest tile <= target that divides `dim` and is a multiple of `align`,
    falling back to the full dim (always layout-legal)."""
    if dim <= target:
        return dim
    t = (target // align) * align
    while t >= align:
        if dim % t == 0:
            return t
        t -= align
    return dim


def _apply_activation(y, activation):
    if activation == "gelu":
        # TODO(synk): torch GELU defaults to the exact erf form; tanh approximation
        # used here (expect ~1e-3 drift vs the PyTorch reference).
        c = 0.7978845608028654
        return 0.5 * y * (1.0 + jnp.tanh(c * (y + 0.044715 * y * y * y)))
    if activation == "tanh":
        return jnp.tanh(y)
    return y


# ----------------------------- Pallas kernels ------------------------------

def _linear_kernel(x_ref, w_ref, b_ref, o_ref, acc_ref, *, activation):
    @pl.when(pl.program_id(2) == 0)
    def _():
        acc_ref[...] = jnp.zeros_like(acc_ref)

    acc_ref[...] += jnp.dot(x_ref[...], w_ref[...],
                            preferred_element_type=jnp.float32)

    @pl.when(pl.program_id(2) == pl.num_programs(2) - 1)
    def _():
        y = acc_ref[...] + b_ref[...].astype(jnp.float32)
        y = _apply_activation(y, activation)
        o_ref[...] = y.astype(o_ref.dtype)


def pallas_linear(x, w, b, activation=None, out_dtype=jnp.bfloat16):
    """y = act(x @ w + b), tiled over (M, N, K) with an f32 accumulator."""
    M, K = x.shape
    N = w.shape[1]
    tm = _tile(M, TM_LIN, 8)
    tn = _tile(N, TN_LIN, 128)
    tk = _tile(K, TK_LIN, 128)
    kernel = functools.partial(_linear_kernel, activation=activation)
    return pl.pallas_call(
        kernel,
        grid=(M // tm, N // tn, K // tk),
        in_specs=[
            pl.BlockSpec((tm, tk), lambda i, j, k: (i, k)),
            pl.BlockSpec((tk, tn), lambda i, j, k: (k, j)),
            pl.BlockSpec((1, tn), lambda i, j, k: (0, j)),
        ],
        out_specs=pl.BlockSpec((tm, tn), lambda i, j, k: (i, j)),
        out_shape=jax.ShapeDtypeStruct((M, N), out_dtype),
        scratch_shapes=[pltpu.VMEM((tm, tn), jnp.float32)],
        compiler_params=pltpu.CompilerParams(
            dimension_semantics=("parallel", "parallel", "arbitrary"),
            vmem_limit_bytes=VMEM_LIMIT),
    )(x, w, b.reshape(1, N))


def _linear_add_ln_kernel(x_ref, w_ref, b_ref, r_ref, g_ref, beta_ref,
                          o_ref, acc_ref, *, eps):
    @pl.when(pl.program_id(1) == 0)
    def _():
        acc_ref[...] = jnp.zeros_like(acc_ref)

    acc_ref[...] += jnp.dot(x_ref[...], w_ref[...],
                            preferred_element_type=jnp.float32)

    @pl.when(pl.program_id(1) == pl.num_programs(1) - 1)
    def _():
        y = (acc_ref[...] + b_ref[...].astype(jnp.float32)
             + r_ref[...].astype(jnp.float32))
        mean = jnp.mean(y, axis=-1, keepdims=True)
        var = jnp.mean(jnp.square(y - mean), axis=-1, keepdims=True)
        yn = (y - mean) * lax.rsqrt(var + eps)
        o_ref[...] = (yn * g_ref[...] + beta_ref[...]).astype(o_ref.dtype)


def pallas_linear_add_ln(x, w, b, residual, gamma, beta, eps=1e-12,
                         out_dtype=jnp.bfloat16):
    """LayerNorm(x @ w + b + residual): matmul with fused residual+LN epilogue.
    N (the hidden dim) is kept whole so the LN reduction stays in one block."""
    M, K = x.shape
    N = w.shape[1]
    tm = _tile(M, TM_LIN, 8)
    tk = _tile(K, TK_LIN, 128)
    kernel = functools.partial(_linear_add_ln_kernel, eps=eps)
    return pl.pallas_call(
        kernel,
        grid=(M // tm, K // tk),
        in_specs=[
            pl.BlockSpec((tm, tk), lambda i, k: (i, k)),
            pl.BlockSpec((tk, N), lambda i, k: (k, 0)),
            pl.BlockSpec((1, N), lambda i, k: (0, 0)),
            pl.BlockSpec((tm, N), lambda i, k: (i, 0)),
            pl.BlockSpec((1, N), lambda i, k: (0, 0)),
            pl.BlockSpec((1, N), lambda i, k: (0, 0)),
        ],
        out_specs=pl.BlockSpec((tm, N), lambda i, k: (i, 0)),
        out_shape=jax.ShapeDtypeStruct((M, N), out_dtype),
        scratch_shapes=[pltpu.VMEM((tm, N), jnp.float32)],
        compiler_params=pltpu.CompilerParams(
            dimension_semantics=("parallel", "arbitrary"),
            vmem_limit_bytes=VMEM_LIMIT),
    )(x, w, b.reshape(1, N), residual, gamma.reshape(1, N), beta.reshape(1, N))


def _layernorm_kernel(x_ref, g_ref, b_ref, o_ref, *, eps):
    x = x_ref[...].astype(jnp.float32)
    mean = jnp.mean(x, axis=-1, keepdims=True)
    var = jnp.mean(jnp.square(x - mean), axis=-1, keepdims=True)
    xn = (x - mean) * lax.rsqrt(var + eps)
    o_ref[...] = (xn * g_ref[...] + b_ref[...]).astype(o_ref.dtype)


def pallas_layernorm(x, g, b, eps=1e-12, out_dtype=jnp.bfloat16):
    M, H = x.shape
    tm = _tile(M, TM_LN, 8)
    kernel = functools.partial(_layernorm_kernel, eps=eps)
    return pl.pallas_call(
        kernel,
        grid=(M // tm,),
        in_specs=[
            pl.BlockSpec((tm, H), lambda i: (i, 0)),
            pl.BlockSpec((1, H), lambda i: (0, 0)),
            pl.BlockSpec((1, H), lambda i: (0, 0)),
        ],
        out_specs=pl.BlockSpec((tm, H), lambda i: (i, 0)),
        out_shape=jax.ShapeDtypeStruct((M, H), out_dtype),
        compiler_params=pltpu.CompilerParams(
            dimension_semantics=("parallel",),
            vmem_limit_bytes=VMEM_LIMIT),
    )(x, g.reshape(1, H), b.reshape(1, H))


def _attention_kernel(mask_ref, qkv_ref, o_ref, *, n_heads, head_dim, scale):
    H = n_heads * head_dim
    mask = mask_ref[0]                              # (1, S), {0., 1.}
    bias = (1.0 - mask) * (-10000.0)                # additive mask (f32)
    ctx = []
    for h in range(n_heads):                        # static unroll; heads split via
        lo = h * head_dim                           # static ref slices on the lane axis
        q = qkv_ref[0, :, lo:lo + head_dim].astype(jnp.float32)            # (S, dh)
        k = qkv_ref[0, :, H + lo:H + lo + head_dim].astype(jnp.float32)    # (S, dh)
        v = qkv_ref[0, :, 2 * H + lo:2 * H + lo + head_dim].astype(jnp.float32)
        s = jnp.einsum("qd,kd->qk", q, k,
                       preferred_element_type=jnp.float32) * scale         # (S, S)
        s = s + bias                                                       # broadcast rows
        m = jnp.max(s, axis=-1, keepdims=True)
        p = jnp.exp(s - m)
        p = p * pl.reciprocal(jnp.sum(p, axis=-1, keepdims=True), approx=True)
        ctx.append(jnp.dot(p, v, preferred_element_type=jnp.float32))      # (S, dh)
    # single lane-dense (S, H) store
    o_ref[0] = jnp.concatenate(ctx, axis=-1).astype(o_ref.dtype)


def pallas_attention(qkv, mask, n_heads):
    """qkv: (B, S, 3H) fused projection; mask: (B, S) {0,1}. Returns (B, S, H)."""
    B, S, H3 = qkv.shape
    H = H3 // 3
    dh = H // n_heads
    scale = 1.0 / math.sqrt(dh)
    mask3 = mask.reshape(B, 1, S).astype(jnp.float32)
    kernel = functools.partial(_attention_kernel, n_heads=n_heads,
                               head_dim=dh, scale=scale)
    return pl.pallas_call(
        kernel,
        grid=(B,),
        in_specs=[
            pl.BlockSpec((1, 1, S), lambda b: (b, 0, 0)),
            pl.BlockSpec((1, S, H3), lambda b: (b, 0, 0)),
        ],
        out_specs=pl.BlockSpec((1, S, H), lambda b: (b, 0, 0)),
        out_shape=jax.ShapeDtypeStruct((B, S, H), jnp.bfloat16),
        compiler_params=pltpu.CompilerParams(
            dimension_semantics=("parallel",),
            vmem_limit_bytes=VMEM_LIMIT),
    )(mask3, qkv)


# --------------------------- parameter construction ------------------------

def init_params(key, *, vocab, max_pos, type_vocab, hidden, n_layers, n_heads,
                intermediate, num_classes):
    keys = iter(jax.random.split(key, 8 + 10 * n_layers))

    def dense(shape, scale=0.02):
        return (scale * jax.random.normal(next(keys), shape)).astype(jnp.bfloat16)

    params = dict(
        n_heads=n_heads,
        tok_emb=(0.02 * jax.random.normal(next(keys), (vocab, hidden))).astype(jnp.float32),
        seg_emb=(0.02 * jax.random.normal(next(keys), (type_vocab, hidden))).astype(jnp.float32),
        pos_emb=(0.02 * jax.random.normal(next(keys), (max_pos, hidden))).astype(jnp.float32),
        emb_ln_g=jnp.ones((hidden,), jnp.float32),
        emb_ln_b=jnp.zeros((hidden,), jnp.float32),
        pool_w=dense((hidden, hidden)),
        pool_b=jnp.zeros((hidden,), jnp.float32),
        cls_w=dense((hidden, num_classes)),       # nn.Linear(hidden, num_classes), stored [in, out]
        cls_b=jnp.zeros((num_classes,), jnp.float32),
        layers=[],
    )
    for _ in range(n_layers):
        wq, wk, wv = dense((hidden, hidden)), dense((hidden, hidden)), dense((hidden, hidden))
        params["layers"].append(dict(
            # fused QKV projection: [H, 3H] weight, [3H] bias
            wqkv=jnp.concatenate([wq, wk, wv], axis=1),
            bqkv=jnp.zeros((3 * hidden,), jnp.float32),
            wo=dense((hidden, hidden)), bo=jnp.zeros((hidden,), jnp.float32),
            ln1_g=jnp.ones((hidden,), jnp.float32), ln1_b=jnp.zeros((hidden,), jnp.float32),
            w1=dense((hidden, intermediate)), b1=jnp.zeros((intermediate,), jnp.float32),
            w2=dense((intermediate, hidden)), b2=jnp.zeros((hidden,), jnp.float32),
            ln2_g=jnp.ones((hidden,), jnp.float32), ln2_b=jnp.zeros((hidden,), jnp.float32),
        ))
    return params


# ------------------------------- forward pass -------------------------------

def gen_attention_mask(token_ids, valid_length):
    # attention_mask[i, :valid_length[i]] = 1  (same as the torch loop)
    S = token_ids.shape[1]
    return (jnp.arange(S)[None, :] < valid_length[:, None]).astype(jnp.float32)


def kbert_classifier_forward(params, token_ids, valid_length, segment_ids):
    B, S = token_ids.shape
    H = params["tok_emb"].shape[1]
    nH = params["n_heads"]

    attention_mask = gen_attention_mask(token_ids, valid_length)

    # embeddings (gathers are glue, kept in plain JAX; sum in f32)
    emb = (params["tok_emb"][token_ids]
           + params["seg_emb"][segment_ids]
           + params["pos_emb"][None, :S, :])
    x = pallas_layernorm(emb.reshape(B * S, H),
                         params["emb_ln_g"], params["emb_ln_b"])      # bf16 (B*S, H)

    for layer in params["layers"]:
        # fused Q/K/V projection: one matmul, one HBM read of x
        qkv = pallas_linear(x, layer["wqkv"], layer["bqkv"])          # bf16 (B*S, 3H)
        # attention with in-kernel head split (no host transposes)
        ctx = pallas_attention(qkv.reshape(B, S, 3 * H), attention_mask, nH)
        ctx = ctx.reshape(B * S, H)
        # output projection + residual + LayerNorm fused
        x = pallas_linear_add_ln(ctx, layer["wo"], layer["bo"], x,
                                 layer["ln1_g"], layer["ln1_b"])
        # FFN: matmul+GELU, then matmul + residual + LayerNorm fused
        ffn = pallas_linear(x, layer["w1"], layer["b1"], activation="gelu")
        x = pallas_linear_add_ln(ffn, layer["w2"], layer["b2"], x,
                                 layer["ln2_g"], layer["ln2_b"])

    seq_out = x.reshape(B, S, H)
    first_tok = seq_out[:, 0, :]                                       # (B, H)
    pooler = pallas_linear(first_tok, params["pool_w"], params["pool_b"],
                           activation="tanh")

    # dr_rate is set in the module; nn.Dropout in eval mode is the identity.
    # TODO(synk): training-mode (stochastic) dropout not implemented.
    out = pooler
    logits = pallas_linear(out, params["cls_w"], params["cls_b"],
                           out_dtype=jnp.float32)                      # (B, num_classes)
    return logits


# ---------------------------------- main ------------------------------------

if __name__ == "__main__":
    B, S = 2, 8
    hidden, n_heads, n_layers, intermediate = 32, 4, 2, 64
    vocab, type_vocab, max_pos, num_classes = 50, 2, 16, 8

    root = jax.random.PRNGKey(0)
    k_params, k_tok = jax.random.split(root)
    params = init_params(k_params, vocab=vocab, max_pos=max_pos,
                         type_vocab=type_vocab, hidden=hidden,
                         n_layers=n_layers, n_heads=n_heads,
                         intermediate=intermediate, num_classes=num_classes)

    token_ids = jax.random.randint(k_tok, (B, S), 0, vocab, dtype=jnp.int32)
    segment_ids = jnp.zeros((B, S), dtype=jnp.int32)
    valid_length = jnp.array([8, 5], dtype=jnp.int32)

    logits = kbert_classifier_forward(params, token_ids, valid_length, segment_ids)
    jax.block_until_ready(logits)
    assert logits.shape == (B, num_classes)
    assert jnp.all(jnp.isfinite(logits))
    print("KERNEL_OK")
</pallas_src>

<mosaic_0001>
module attributes {stable_mosaic.version = 11 : i64} {
  func.func @_layernorm_kernel(%arg0: i32, %arg1: memref<16x32xf32, #tpu.memory_space<vmem>>, %arg2: memref<1x32xf32, #tpu.memory_space<vmem>>, %arg3: memref<1x32xf32, #tpu.memory_space<vmem>>, %arg4: memref<16x32xbf16, #tpu.memory_space<vmem>>) attributes {dimension_semantics = [#tpu.dimension_semantics<parallel>], iteration_bounds = array<i64: 1>, scalar_prefetch = 0 : i64, scratch_operands = 0 : i64, tpu.core_type = #tpu.core_type<tc>, window_params = [{transform_indices = @transform_0, window_bounds = array<i64: 16, 32>}, {pipeline_mode = #tpu.pipeline_mode<synchronous>, transform_indices = @transform_1, window_bounds = array<i64: 1, 32>}, {pipeline_mode = #tpu.pipeline_mode<synchronous>, transform_indices = @transform_2, window_bounds = array<i64: 1, 32>}, {transform_indices = @transform_3, window_bounds = array<i64: 16, 32>}]} {
    %c0 = arith.constant 0 : index
    %c0_0 = arith.constant 0 : index
    %0 = vector.load %arg1[%c0, %c0_0] : memref<16x32xf32, #tpu.memory_space<vmem>>, vector<16x32xf32>
    %cst = arith.constant dense<0.000000e+00> : vector<16xf32>
    %1 = vector.multi_reduction <add>, %0, %cst [1] : vector<16x32xf32> to vector<16xf32>
    %2 = vector.shape_cast %1 : vector<16xf32> to vector<16x1xf32>
    %cst_1 = arith.constant 3.200000e+01 : f32
    %3 = vector.broadcast %cst_1 : f32 to vector<16x1xf32>
    %4 = arith.divf %2, %3 : vector<16x1xf32>
    %5 = vector.broadcast %4 : vector<16x1xf32> to vector<16x32xf32>
    %6 = arith.subf %0, %5 : vector<16x32xf32>
    %7 = arith.mulf %6, %6 : vector<16x32xf32>
    %cst_2 = arith.constant dense<0.000000e+00> : vector<16xf32>
    %8 = vector.multi_reduction <add>, %7, %cst_2 [1] : vector<16x32xf32> to vector<16xf32>
    %9 = vector.shape_cast %8 : vector<16xf32> to vector<16x1xf32>
    %cst_3 = arith.constant 3.200000e+01 : f32
    %10 = vector.broadcast %cst_3 : f32 to vector<16x1xf32>
    %11 = arith.divf %9, %10 : vector<16x1xf32>
    %12 = vector.broadcast %4 : vector<16x1xf32> to vector<16x32xf32>
    %13 = arith.subf %0, %12 : vector<16x32xf32>
    %cst_4 = arith.constant 9.99999996E-13 : f32
    %14 = vector.broadcast %cst_4 : f32 to vector<16x1xf32>
    %15 = arith.addf %11, %14 : vector<16x1xf32>
    %16 = math.rsqrt %15 : vector<16x1xf32>
    %17 = vector.broadcast %16 : vector<16x1xf32> to vector<16x32xf32>
    %18 = arith.mulf %13, %17 : vector<16x32xf32>
    %c0_5 = arith.constant 0 : index
    %c0_6 = arith.constant 0 : index
    %19 = vector.load %arg2[%c0_5, %c0_6] : memref<1x32xf32, #tpu.memory_space<vmem>>, vector<1x32xf32>
    %20 = vector.broadcast %19 : vector<1x32xf32> to vector<16x32xf32>
    %21 = arith.mulf %18, %20 : vector<16x32xf32>
    %c0_7 = arith.constant 0 : index
    %c0_8 = arith.constant 0 : index
    %22 = vector.load %arg3[%c0_7, %c0_8] : memref<1x32xf32, #tpu.memory_space<vmem>>, vector<1x32xf32>
    %23 = vector.broadcast %22 : vector<1x32xf32> to vector<16x32xf32>
    %24 = arith.addf %21, %23 : vector<16x32xf32>
    %25 = arith.truncf %24 : vector<16x32xf32> to vector<16x32xbf16>
    %c0_9 = arith.constant 0 : index
    %c0_10 = arith.constant 0 : index
    %26 = vector.load %arg4[%c0_9, %c0_10] : memref<16x32xbf16, #tpu.memory_space<vmem>>, vector<16x32xbf16>
    tpu.vector_store %arg4[%c0_9, %c0_10], %25 {strides = array<i32>} : memref<16x32xbf16, #tpu.memory_space<vmem>>, vector<16x32xbf16>,
    return
  }
  func.func @transform_0(%arg0: i32) -> (i32, i32) {
    %c0_i32 = arith.constant 0 : i32
    %c0_i32_0 = arith.constant 0 : i32
    return %arg0, %c0_i32 : i32, i32
  }
  func.func @transform_1(%arg0: i32) -> (i32, i32) {
    %c0_i32 = arith.constant 0 : i32
    %c0_i32_0 = arith.constant 0 : i32
    %c0_i32_1 = arith.constant 0 : i32
    return %c0_i32, %c0_i32_0 : i32, i32
  }
  func.func @transform_2(%arg0: i32) -> (i32, i32) {
    %c0_i32 = arith.constant 0 : i32
    %c0_i32_0 = arith.constant 0 : i32
    %c0_i32_1 = arith.constant 0 : i32
    return %c0_i32, %c0_i32_0 : i32, i32
  }
  func.func @transform_3(%arg0: i32) -> (i32, i32) {
    %c0_i32 = arith.constant 0 : i32
    %c0_i32_0 = arith.constant 0 : i32
    return %arg0, %c0_i32 : i32, i32
  }
}

</mosaic_0001>

<bundles_post_ra>
// kernel: tpu_custom_call.1
= control target key start
LH: loop header
LB: loop body
LE: loop exit
PB: predicated region body
PF: predicated region fallthrough
CT: control target
= control target key end

     0   :  { %8 = vsyncpa [#allocation3], 0  ;;  %s328_s0 = inlined_call_operand.hbm [shape: f32[16,32], index: 0, kind: input, shape index: {}]   ;;  %s329_s1 = inlined_call_operand.hbm [shape: f32[1,32], index: 1, kind: input, shape index: {}]   ;;  %s330_s2 = inlined_call_operand.hbm [shape: f32[1,32], index: 2, kind: input, shape index: {}]   ;;  %s331_s3 = inlined_call_operand.hbm [shape: bf16[16,32], index: 3, kind: output, shape index: {}]  }
   0x1   :  { %9 = vsyncpa [#allocation6], 0 }
   0x2   :  { %10 = vsyncpa [#allocation4], 0  ;;  %s241_s12 = smov [#allocation5]   ;;  %s242_s14 = smov [#allocation2]  }
   0x3   :  { %s29_s13 = sshll.u32 %s241_s12, 4  ;;  %s16_s15 = sshll.u32 %s242_s14, 4  ;;  %s30_s13 = int_to_ptr.vmem [resolvable:$true] %s29_s13  ;;  %s269_s15 = int_to_ptr.vmem [resolvable:$true] %s16_s15 }
   0x4   :  { %s147_s18 = scalar_lea.hbm %s329_s1, 16 }
   0x5   :  { %p148_p0 = scmp.ne.s32.totalorder %s329_s1, %s147_s18  ;;  %p151_p1 = scmp.lt.u32.totalorder %s147_s18, %s329_s1 }
   0x7   :  { %p153_p2 = pnand %p151_p1, %p148_p0 }
   0x9   :  { %156 = shalt.err (!%p153_p2)
}
   0xa   :  { %s157_s23 = scalar_lea.vmem %s30_s13, 16  ;;  %s161_s24 = scalar_lea.vmem %s30_s13, 32 }
   0xb   :  { %p158_p3 = scmp.ne.s32.totalorder %s30_s13, %s157_s23  ;;  %p162_p4 = scmp.lt.s32.totalorder %s30_s13, %s30_s13 }
   0xc   :  { %p163_p5 = scmp.lt.s32.totalorder %s161_s24, %s157_s23 }
   0xe   :  { %p164_p6 = por %p163_p5, %p162_p4 }
  0x10   :  { %p165_p7 = pnand %p164_p6, %p158_p3 }
  0x12   :  { %168 = shalt.err (!%p165_p7)
}
  0x13   :  { %32 = dma.hbm_to_vmem [thread:$0]  %s329_s1, 16, %s30_s13, [#allocation6]  }
  0x14   :  { %s169_s29 = scalar_lea.hbm %s328_s0, 256 }
  0x15   :  { %p170_p8 = scmp.ne.s32.totalorder %s328_s0, %s169_s29  ;;  %p173_p9 = scmp.lt.u32.totalorder %s169_s29, %s328_s0 }
  0x17   :  { %p175_p10 = pnand %p173_p9, %p170_p8 }
  0x19   :  { %178 = shalt.err (!%p175_p10)
}
  0x1a   :  { %s179_s7 = scalar_lea.vmem %s269_s15, 256  ;;  %p184_p12 = scmp.lt.s32.totalorder %s269_s15, %s269_s15 }
  0x1b   :  { %p180_p11 = scmp.ne.s32.totalorder %s269_s15, %s179_s7  ;;  %p185_p13 = scmp.lt.s32.totalorder %s179_s7, %s179_s7 }
  0x1d   :  { %p186_p0 = por %p185_p13, %p184_p12 }
  0x1f   :  { %p187_p1 = pnand %p186_p0, %p180_p11 }
  0x21   :  { %190 = shalt.err (!%p187_p1)
}
  0x22   :  { %s243_s1 = smov 128   ;;  %s244_s8 = smov 8  }
  0x23   :  { %22 = dma.hbm_to_vmem [thread:$0]  %s328_s0, 256, %s269_s15, [#allocation3], %s243_s1, %s243_s1, %s244_s8  }
  0x24   :  { %s245_s11 = smov [#allocation7]   ;;  %s191_s16 = scalar_lea.hbm %s330_s2, 16 }
  0x25   :  { %s39_s12 = sshll.u32 %s245_s11, 4  ;;  %p192_p2 = scmp.ne.s32.totalorder %s330_s2, %s191_s16  ;;  %s40_s12 = int_to_ptr.vmem [resolvable:$true] %s39_s12 }
  0x26   :  { %p195_p3 = scmp.lt.u32.totalorder %s191_s16, %s330_s2 }
  0x28   :  { %p197_p4 = pnand %p195_p3, %p192_p2 }
  0x2a   :  { %200 = shalt.err (!%p197_p4)
}
  0x2b   :  { %s201_s21 = scalar_lea.vmem %s40_s12, 16  ;;  %s205_s0 = scalar_lea.vmem %s40_s12, 32 }
  0x2c   :  { %p202_p5 = scmp.ne.s32.totalorder %s40_s12, %s201_s21  ;;  %p206_p6 = scmp.lt.s32.totalorder %s40_s12, %s40_s12 }
  0x2d   :  { %p207_p7 = scmp.lt.s32.totalorder %s205_s0, %s201_s21 }
  0x2f   :  { %p208_p8 = por %p207_p7, %p206_p6 }
  0x31   :  { %p209_p9 = pnand %p208_p8, %p202_p5 }
  0x33   :  { %212 = shalt.err (!%p209_p9)
}
  0x34   :  { %42 = dma.hbm_to_vmem [thread:$0]  %s330_s2, 16, %s40_s12, [#allocation6]  }
  0x35   :  { %235 = dma.done.wait [#allocation3], 256  }
  0x36   :  { %236 = vsyncadd [#allocation3], 4294967040 }
  0x37   :  { %237 = dma.done.wait [#allocation6], 32  }
  0x38   :  { %238 = vsyncadd [#allocation6], 4294967264  ;;  %vm54_vm0 = vcmask 261120   ;;  %v52_v0 = vld [vmem:[#allocation2] sm:$0xff]  ;;  %v53_v1 = vld [vmem:[#allocation2 + $0x8] sm:$0xff]  ;;  %vm108_vm1 = vcmask 257024  }
  0x39   :  { %v55_v2 = vsel %vm54_vm0, %v52_v0, 0.0  ;;  %v58_v3 = vsel %vm54_vm0, %v53_v1, 0.0  ;;  %v129_v21 = vld [vmem:[#allocation5] ss:$0 sm:$0xff]  ;;  %v130_v23 = vld [vmem:[#allocation7] ss:$0 sm:$0xff] }
  0x3a   :  { %56 = vadd.xlane.f32.xlu0 %v55_v2  ;;  %s246_s2 = smov [#allocation8]  }
  0x3b   :  { %s116_s23 = sshll.u32 %s246_s2, 4  ;;  %s117_s23 = int_to_ptr.vmem [resolvable:$true] %s116_s23 }
  0x3c   :  { %s213_s24 = scalar_lea.vmem %s117_s23, 128  ;;  %p218_p11 = scmp.lt.s32.totalorder %s117_s23, %s117_s23 }
  0x3d   :  { %p214_p10 = scmp.ne.s32.totalorder %s117_s23, %s213_s24  ;;  %p219_p12 = scmp.lt.s32.totalorder %s213_s24, %s213_s24 }
  0x3e   :  { %59 = vadd.xlane.f32.xlu0 %v58_v3 }
  0x3f   :  { %p220_p13 = por %p219_p12, %p218_p11 }
  0x41   :  { %p221_p0 = pnand %p220_p13, %p214_p10 }
  0xc7   :  { %v57_v4 = vpop.xlane.xlu0 %56 }
  0xc8   :  { %v62_v5 = vmul.f32 0.03125, %v57_v4 }
  0xca   :  { %v64_v6 = vsub.f32 %v52_v0, %v62_v5 }
  0xcb   :  { %v60_v7 = vpop.xlane.xlu0 %59 }
  0xcc   :  { %v63_v8 = vmul.f32 0.03125, %v60_v7  ;;  %v66_v9 = vmul.f32 %v64_v6, %v64_v6 }
  0xce   :  { %v65_v10 = vsub.f32 %v53_v1, %v63_v8  ;;  %v68_v11 = vsel %vm54_vm0, %v66_v9, 0.0 }
  0xcf   :  { %69 = vadd.xlane.f32.xlu1 %v68_v11 }
  0xd0   :  { %v67_v12 = vmul.f32 %v65_v10, %v65_v10 }
  0xd2   :  { %v71_v13 = vsel %vm54_vm0, %v67_v12, 0.0 }
  0xd3   :  { %72 = vadd.xlane.f32.xlu1 %v71_v13 }
 0x15c   :  { %v70_v14 = vpop.xlane.xlu1 %69 }
 0x15d   :  { %v74_v15 = vmul.f32 0.03125, %v70_v14 }
 0x15f   :  { %v76_v16 = vadd.f32 1e-12, %v74_v15 }
 0x160   :  { %v73_v17 = vpop.xlane.xlu1 %72 }
 0x161   :  { %143 = vrsqrt.f32 %v76_v16  ;;  %v75_v18 = vmul.f32 0.03125, %v73_v17 }
 0x163   :  { %v77_v19 = vadd.f32 1e-12, %v75_v18 }
 0x165   :  { %145 = vrsqrt.f32 %v77_v19 }
 0x16b   :  { %v144_v20 = vpop.eup %143 }
 0x16c   :  { %v80_v22 = vmul.f32 %v144_v20, %v64_v6 }
 0x16e   :  { %v89_v24 = vmul.f32 %v129_v21, %v80_v22 }
 0x16f   :  { %v146_v25 = vpop.eup %145 }
 0x170   :  { %v81_v26 = vmul.f32 %v146_v25, %v65_v10  ;;  %v98_v27 = vadd.f32 %v130_v23, %v89_v24 }
 0x172   :  { %v90_v28 = vmul.f32 %v129_v21, %v81_v26  ;;  %v133_v29 = vpack.c.bf16 %v98_v27, %v98_v27 }
 0x174   :  { %v99_v30 = vadd.f32 %v130_v23, %v90_v28  ;;  %109 = vst.msk [vmem:[#allocation8] sm:$0xf] %vm108_vm1, %v133_v29 }
 0x176   :  { %v134_v31 = vpack.c.bf16 %v99_v30, %v99_v30 }
 0x178   :  { %110 = vst.msk [vmem:[#allocation8 + $0x4] sm:$0xf] %vm108_vm1, %v134_v31 }
 0x179   :  { %224 = shalt.err (!%p221_p0)
}
 0x17a   :  { %s225_s27 = scalar_lea.hbm %s331_s3, 128 }
 0x17b   :  { %p226_p1 = scmp.ne.s32.totalorder %s331_s3, %s225_s27  ;;  %p229_p2 = scmp.lt.u32.totalorder %s225_s27, %s331_s3 }
 0x17d   :  { %p231_p3 = pnand %p229_p2, %p226_p1 }
 0x17f   :  { %234 = shalt.err (!%p231_p3)
}
 0x180   :  { %s247_s5 = smov 64   ;;  %s248_s6 = smov 4  }
 0x181   :  { %122 = dma.vmem_to_hbm [thread:$0]  %s117_s23, 128, %s331_s3, [#allocation4], %s247_s5, %s247_s5, %s248_s6  }
 0x182   :  { %239 = dma.done.wait [#allocation4], 128  }
 0x183   :  { %240 = vsyncadd [#allocation4], 4294967168 }
 0x184   :  { %126 = vsyncpa [#allocation3], 1 }
 0x185   :  { %127 = vsyncpa [#allocation6], 1 }
 0x186   :  { %128 = vsyncpa [#allocation4], 1 }

</bundles_post_ra>
